<compile_context>
chip_gen: v5e
topology: v5e:2x2
jax: 0.10.0
libtpu: 0.0.40
codegen_flags: <defaults>
</compile_context>

<pallas_src>
import jax
import jax.numpy as jnp
from jax.experimental import pallas as pl
from jax.experimental.pallas import tpu as pltpu

DIM = 16          # MLPDiffusion io width (nn.Linear(16, ...))
NUM_UNITS = 128   # hidden width
NUM_STEPS = 16    # n_steps for the step embeddings
BATCH = 4         # example batch
SUBLANE = 8       # f32 sublane tile
XE_W = DIM + NUM_STEPS          # 32  : [x | one_hot(t)]


def _round_up(n, m):
    return ((n + m - 1) // m) * m


# ------------------------------ Pallas kernel ------------------------------------
def mlp_diffusion_kernel(xe_ref, wa_ref, wb_ref, bias_ref, out_ref):
    """Fused forward for one batch tile.

    xe_ref  : (TB, 32)   f32   [x | one_hot(t)]
    wa_ref  : (32, 384)  f32   [[W1;E1] | [0;E2] | [0;E3]]
    wb_ref  : (128, 384) f32   [W2 | W3 | W4 (zero-padded to 128 cols)]
    bias_ref: (1, 512)   f32   [b1 | b2 | b3 | b4 (zero-padded to 128 cols)]
    out_ref : (TB, 16)   f32
    """
    xe = xe_ref[...]                                                   # (TB, 32)

    # One MXU pass yields the first pre-activation AND both remaining
    # step-embedding rows: [x@W1 + E1[t] | E2[t] | E3[t]].
    z = jnp.dot(xe, wa_ref[...], preferred_element_type=jnp.float32)  # (TB, 384)

    h = jnp.maximum(z[:, 0:128] + bias_ref[:, 0:128], 0.0)

    h = jnp.dot(h, wb_ref[:, 0:128], preferred_element_type=jnp.float32)
    h = jnp.maximum(h + bias_ref[:, 128:256] + z[:, 128:256], 0.0)

    h = jnp.dot(h, wb_ref[:, 128:256], preferred_element_type=jnp.float32)
    h = jnp.maximum(h + bias_ref[:, 256:384] + z[:, 256:384], 0.0)

    out = jnp.dot(h, wb_ref[:, 256:384], preferred_element_type=jnp.float32)
    out_ref[...] = out[:, :DIM] + bias_ref[:, 384:384 + DIM]


# ------------------------------ param packing (once, host-side) -------------------
def pack_params(p):
    zeros_d = jnp.zeros((DIM, NUM_UNITS), jnp.float32)
    wa = jnp.concatenate(
        [jnp.concatenate([p["W1"], p["E1"]], axis=0),      # (32, 128)
         jnp.concatenate([zeros_d, p["E2"]], axis=0),      # (32, 128)
         jnp.concatenate([zeros_d, p["E3"]], axis=0)],     # (32, 128)
        axis=1)                                            # (32, 384)
    w4_pad = jnp.pad(p["W4"], ((0, 0), (0, NUM_UNITS - DIM)))   # (128, 128)
    wb = jnp.concatenate([p["W2"], p["W3"], w4_pad], axis=1)    # (128, 384)
    b4_pad = jnp.pad(p["b4"], ((0, 0), (0, NUM_UNITS - DIM)))   # (1, 128)
    bias = jnp.concatenate([p["b1"], p["b2"], p["b3"], b4_pad], axis=1)  # (1, 512)
    return {"Wa": wa, "Wb": wb, "bias": bias}


# ------------------------------ wrapper -------------------------------------------
def mlp_diffusion_forward(x, t, packed):
    """x: (B, 16) f32, t: (B,) int -> (B, 16) f32."""
    B = x.shape[0]
    # Full-MXU batch tiles when the batch is big; sublane-aligned otherwise.
    tile_b = 256 if B >= 256 else _round_up(max(B, 1), SUBLANE)
    Bp = _round_up(B, tile_b)

    onehot = jax.nn.one_hot(t, NUM_STEPS, dtype=jnp.float32)           # (B, 16)
    xe = jnp.concatenate([x.astype(jnp.float32), onehot], axis=1)      # (B, 32)
    xe = jnp.pad(xe, ((0, Bp - B), (0, 0)))                            # (Bp, 32)

    grid = (Bp // tile_b,)
    out = pl.pallas_call(
        mlp_diffusion_kernel,
        out_shape=jax.ShapeDtypeStruct((Bp, DIM), jnp.float32),
        grid=grid,
        in_specs=[
            pl.BlockSpec((tile_b, XE_W), lambda i: (i, 0)),            # batch-tiled
            pl.BlockSpec((XE_W, 3 * NUM_UNITS), lambda i: (0, 0)),     # resident
            pl.BlockSpec((NUM_UNITS, 3 * NUM_UNITS), lambda i: (0, 0)),# resident
            pl.BlockSpec((1, 4 * NUM_UNITS), lambda i: (0, 0)),        # resident
        ],
        out_specs=pl.BlockSpec((tile_b, DIM), lambda i: (i, 0)),
        compiler_params=pltpu.CompilerParams(
            dimension_semantics=("parallel",)),                        # v7x: 2 TCs
    )(xe, packed["Wa"], packed["Wb"], packed["bias"])
    return out[:B]


mlp_diffusion_forward_jit = jax.jit(mlp_diffusion_forward)


# ------------------------------ reference (pure JAX) ------------------------------
def mlp_diffusion_reference(x, t, p):
    hi = jax.lax.Precision.HIGHEST
    h = jnp.dot(x, p["W1"], precision=hi) + p["b1"] + p["E1"][t]
    h = jnp.maximum(h, 0.0)
    h = jnp.dot(h, p["W2"], precision=hi) + p["b2"] + p["E2"][t]
    h = jnp.maximum(h, 0.0)
    h = jnp.dot(h, p["W3"], precision=hi) + p["b3"] + p["E3"][t]
    h = jnp.maximum(h, 0.0)
    return jnp.dot(h, p["W4"], precision=hi) + p["b4"]


# ------------------------------ parameter init ------------------------------------
def _linear_init(key, fan_in, fan_out):
    kw, kb = jax.random.split(key)
    w = jax.random.normal(kw, (fan_in, fan_out), jnp.float32) / jnp.sqrt(float(fan_in))
    b = 0.01 * jax.random.normal(kb, (1, fan_out), jnp.float32)
    return w, b


def make_params(key):
    keys = jax.random.split(key, 8)
    p = {}
    p["W1"], p["b1"] = _linear_init(keys[0], DIM, NUM_UNITS)
    p["W2"], p["b2"] = _linear_init(keys[1], NUM_UNITS, NUM_UNITS)
    p["W3"], p["b3"] = _linear_init(keys[2], NUM_UNITS, NUM_UNITS)
    p["W4"], p["b4"] = _linear_init(keys[3], NUM_UNITS, DIM)
    p["E1"] = 0.1 * jax.random.normal(keys[4], (NUM_STEPS, NUM_UNITS), jnp.float32)
    p["E2"] = 0.1 * jax.random.normal(keys[5], (NUM_STEPS, NUM_UNITS), jnp.float32)
    p["E3"] = 0.1 * jax.random.normal(keys[6], (NUM_STEPS, NUM_UNITS), jnp.float32)
    return p


# ------------------------------------ main ----------------------------------------
if __name__ == "__main__":
    key = jax.random.PRNGKey(0)
    k_params, k_x, k_t = jax.random.split(key, 3)

    params = make_params(k_params)
    packed = jax.tree_util.tree_map(jax.block_until_ready, pack_params(params))

    x = jax.random.normal(k_x, (BATCH, DIM), jnp.float32)
    t = jax.random.randint(k_t, (BATCH,), 0, NUM_STEPS)

    out = mlp_diffusion_forward_jit(x, t, packed)
    out = jax.block_until_ready(out)
    assert out.shape == (BATCH, DIM)
    assert bool(jnp.all(jnp.isfinite(out)))

    ref = jax.block_until_ready(mlp_diffusion_reference(x, t, params))
    assert bool(jnp.allclose(out, ref, rtol=1e-2, atol=1e-2)), (
        f"max abs err {float(jnp.max(jnp.abs(out - ref)))}"
    )

    print("KERNEL_OK")
</pallas_src>

<mosaic_0001>
module attributes {stable_mosaic.version = 11 : i64} {
  func.func @mlp_diffusion_kernel(%arg0: i32, %arg1: memref<8x32xf32, #tpu.memory_space<vmem>>, %arg2: memref<32x384xf32, #tpu.memory_space<vmem>>, %arg3: memref<128x384xf32, #tpu.memory_space<vmem>>, %arg4: memref<1x512xf32, #tpu.memory_space<vmem>>, %arg5: memref<8x16xf32, #tpu.memory_space<vmem>>) attributes {dimension_semantics = [#tpu.dimension_semantics<parallel>], iteration_bounds = array<i64: 1>, scalar_prefetch = 0 : i64, scratch_operands = 0 : i64, tpu.core_type = #tpu.core_type<tc>, window_params = [{transform_indices = @transform_0, window_bounds = array<i64: 8, 32>}, {pipeline_mode = #tpu.pipeline_mode<synchronous>, transform_indices = @transform_1, window_bounds = array<i64: 32, 384>}, {pipeline_mode = #tpu.pipeline_mode<synchronous>, transform_indices = @transform_2, window_bounds = array<i64: 128, 384>}, {pipeline_mode = #tpu.pipeline_mode<synchronous>, transform_indices = @transform_3, window_bounds = array<i64: 1, 512>}, {transform_indices = @transform_4, window_bounds = array<i64: 8, 16>}]} {
    %c0 = arith.constant 0 : index
    %c0_0 = arith.constant 0 : index
    %0 = vector.load %arg1[%c0, %c0_0] : memref<8x32xf32, #tpu.memory_space<vmem>>, vector<8x32xf32>
    %c0_1 = arith.constant 0 : index
    %c0_2 = arith.constant 0 : index
    %1 = vector.load %arg2[%c0_1, %c0_2] : memref<32x384xf32, #tpu.memory_space<vmem>>, vector<32x384xf32>
    %cst = arith.constant dense<0.000000e+00> : vector<8x384xf32>
    %2 = tpu.matmul %0, %1, %cst {dimension_numbers = #tpu.dot_dimension_numbers<[1], [0], [0], [1], [0, 0, 1, 1], [], []>} : vector<8x32xf32>, vector<32x384xf32>, vector<8x384xf32> -> vector<8x384xf32>
    %3 = vector.extract_strided_slice %2 {offsets = [0, 0], sizes = [8, 128], strides = [1, 1]} : vector<8x384xf32> to vector<8x128xf32>
    %c0_3 = arith.constant 0 : index
    %c0_4 = arith.constant 0 : index
    %4 = vector.load %arg4[%c0_3, %c0_4] : memref<1x512xf32, #tpu.memory_space<vmem>>, vector<1x128xf32>
    %5 = vector.broadcast %4 : vector<1x128xf32> to vector<8x128xf32>
    %6 = arith.addf %3, %5 : vector<8x128xf32>
    %cst_5 = arith.constant 0.000000e+00 : f32
    %7 = vector.broadcast %cst_5 : f32 to vector<8x128xf32>
    %8 = arith.maximumf %6, %7 : vector<8x128xf32>
    %c0_6 = arith.constant 0 : index
    %c0_7 = arith.constant 0 : index
    %9 = vector.load %arg3[%c0_6, %c0_7] : memref<128x384xf32, #tpu.memory_space<vmem>>, vector<128x128xf32>
    %cst_8 = arith.constant dense<0.000000e+00> : vector<8x128xf32>
    %10 = tpu.matmul %8, %9, %cst_8 {dimension_numbers = #tpu.dot_dimension_numbers<[1], [0], [0], [1], [0, 0, 1, 1], [], []>} : vector<8x128xf32>, vector<128x128xf32>, vector<8x128xf32> -> vector<8x128xf32>
    %c0_9 = arith.constant 0 : index
    %c128 = arith.constant 128 : index
    %11 = vector.load %arg4[%c0_9, %c128] : memref<1x512xf32, #tpu.memory_space<vmem>>, vector<1x128xf32>
    %12 = vector.broadcast %11 : vector<1x128xf32> to vector<8x128xf32>
    %13 = arith.addf %10, %12 : vector<8x128xf32>
    %14 = vector.extract_strided_slice %2 {offsets = [0, 128], sizes = [8, 128], strides = [1, 1]} : vector<8x384xf32> to vector<8x128xf32>
    %15 = arith.addf %13, %14 : vector<8x128xf32>
    %cst_10 = arith.constant 0.000000e+00 : f32
    %16 = vector.broadcast %cst_10 : f32 to vector<8x128xf32>
    %17 = arith.maximumf %15, %16 : vector<8x128xf32>
    %c0_11 = arith.constant 0 : index
    %c128_12 = arith.constant 128 : index
    %18 = vector.load %arg3[%c0_11, %c128_12] : memref<128x384xf32, #tpu.memory_space<vmem>>, vector<128x128xf32>
    %cst_13 = arith.constant dense<0.000000e+00> : vector<8x128xf32>
    %19 = tpu.matmul %17, %18, %cst_13 {dimension_numbers = #tpu.dot_dimension_numbers<[1], [0], [0], [1], [0, 0, 1, 1], [], []>} : vector<8x128xf32>, vector<128x128xf32>, vector<8x128xf32> -> vector<8x128xf32>
    %c0_14 = arith.constant 0 : index
    %c256 = arith.constant 256 : index
    %20 = vector.load %arg4[%c0_14, %c256] : memref<1x512xf32, #tpu.memory_space<vmem>>, vector<1x128xf32>
    %21 = vector.broadcast %20 : vector<1x128xf32> to vector<8x128xf32>
    %22 = arith.addf %19, %21 : vector<8x128xf32>
    %23 = vector.extract_strided_slice %2 {offsets = [0, 256], sizes = [8, 128], strides = [1, 1]} : vector<8x384xf32> to vector<8x128xf32>
    %24 = arith.addf %22, %23 : vector<8x128xf32>
    %cst_15 = arith.constant 0.000000e+00 : f32
    %25 = vector.broadcast %cst_15 : f32 to vector<8x128xf32>
    %26 = arith.maximumf %24, %25 : vector<8x128xf32>
    %c0_16 = arith.constant 0 : index
    %c256_17 = arith.constant 256 : index
    %27 = vector.load %arg3[%c0_16, %c256_17] : memref<128x384xf32, #tpu.memory_space<vmem>>, vector<128x128xf32>
    %cst_18 = arith.constant dense<0.000000e+00> : vector<8x128xf32>
    %28 = tpu.matmul %26, %27, %cst_18 {dimension_numbers = #tpu.dot_dimension_numbers<[1], [0], [0], [1], [0, 0, 1, 1], [], []>} : vector<8x128xf32>, vector<128x128xf32>, vector<8x128xf32> -> vector<8x128xf32>
    %29 = vector.extract_strided_slice %28 {offsets = [0, 0], sizes = [8, 16], strides = [1, 1]} : vector<8x128xf32> to vector<8x16xf32>
    %c0_19 = arith.constant 0 : index
    %c384 = arith.constant 384 : index
    %30 = vector.load %arg4[%c0_19, %c384] : memref<1x512xf32, #tpu.memory_space<vmem>>, vector<1x16xf32>
    %31 = vector.broadcast %30 : vector<1x16xf32> to vector<8x16xf32>
    %32 = arith.addf %29, %31 : vector<8x16xf32>
    %c0_20 = arith.constant 0 : index
    %c0_21 = arith.constant 0 : index
    %33 = vector.load %arg5[%c0_20, %c0_21] : memref<8x16xf32, #tpu.memory_space<vmem>>, vector<8x16xf32>
    tpu.vector_store %arg5[%c0_20, %c0_21], %32 {strides = array<i32>} : memref<8x16xf32, #tpu.memory_space<vmem>>, vector<8x16xf32>,
    return
  }
  func.func @transform_0(%arg0: i32) -> (i32, i32) {
    %c0_i32 = arith.constant 0 : i32
    %c0_i32_0 = arith.constant 0 : i32
    return %arg0, %c0_i32 : i32, i32
  }
  func.func @transform_1(%arg0: i32) -> (i32, i32) {
    %c0_i32 = arith.constant 0 : i32
    %c0_i32_0 = arith.constant 0 : i32
    %c0_i32_1 = arith.constant 0 : i32
    return %c0_i32, %c0_i32_0 : i32, i32
  }
  func.func @transform_2(%arg0: i32) -> (i32, i32) {
    %c0_i32 = arith.constant 0 : i32
    %c0_i32_0 = arith.constant 0 : i32
    %c0_i32_1 = arith.constant 0 : i32
    return %c0_i32, %c0_i32_0 : i32, i32
  }
  func.func @transform_3(%arg0: i32) -> (i32, i32) {
    %c0_i32 = arith.constant 0 : i32
    %c0_i32_0 = arith.constant 0 : i32
    %c0_i32_1 = arith.constant 0 : i32
    return %c0_i32, %c0_i32_0 : i32, i32
  }
  func.func @transform_4(%arg0: i32) -> (i32, i32) {
    %c0_i32 = arith.constant 0 : i32
    %c0_i32_0 = arith.constant 0 : i32
    return %arg0, %c0_i32 : i32, i32
  }
}

</mosaic_0001>

<bundles_post_ra>
// kernel: mlp_diffusion_forward.1
= control target key start
LH: loop header
LB: loop body
LE: loop exit
PB: predicated region body
PF: predicated region fallthrough
CT: control target
= control target key end

     0   :  { %9 = vsyncpa [#allocation3], 0  ;;  %s389_s0 = inlined_call_operand.vmem [shape: f32[8,32], index: 0, kind: input, shape index: {}]   ;;  %s390_s1 = inlined_call_operand.hbm [shape: f32[32,384], index: 1, kind: input, shape index: {}]   ;;  %s391_s2 = inlined_call_operand.hbm [shape: f32[128,384], index: 2, kind: input, shape index: {}]   ;;  %s392_s3 = inlined_call_operand.vmem [shape: f32[1,512], index: 3, kind: input, shape index: {}]   ;;  %s393_s4 = inlined_call_operand.vmem [shape: f32[8,16], index: 4, kind: output, shape index: {}]  }
   0x1   :  { %s17_s17 = sshll.u32 %s390_s1, 4  ;;  %s18_s17 = int_to_ptr.hbm [resolvable:$true] %s17_s17 }
   0x2   :  { %10 = vsyncpa [#allocation5], 0  ;;  %s328_s18 = smov [#allocation2]   ;;  %s30_s22 = sshll.u32 %s391_s2, 4  ;;  %s31_s22 = int_to_ptr.hbm [resolvable:$true] %s30_s22 }
   0x3   :  { %s19_s19 = sshll.u32 %s328_s18, 4  ;;  %s329_s23 = smov 384   ;;  %s20_s19 = int_to_ptr.vmem [resolvable:$true] %s19_s19 }
   0x4   :  { %s330_s24 = smov 24   ;;  %s331_s25 = smov [#allocation4]  }
   0x5   :  { %25 = dma.hbm_to_vmem [thread:$0]  %s18_s17, 1536, %s20_s19, [#allocation3], %s329_s23, %s329_s23, %s330_s24  }
   0x6   :  { %s32_s26 = sshll.u32 %s331_s25, 4  ;;  %s33_s26 = int_to_ptr.vmem [resolvable:$true] %s32_s26 }
   0x7   :  { %38 = dma.hbm_to_vmem [thread:$0]  %s31_s22, 6144, %s33_s26, [#allocation5], %s329_s23, %s329_s23, %s330_s24  }
   0x8   :  { %324 = dma.done.wait [#allocation3], 1536  }
   0x9   :  { %325 = vsyncadd [#allocation3], 4294965760 }
   0xa   :  { %326 = dma.done.wait [#allocation5], 6144  }
   0xb   :  { %327 = vsyncadd [#allocation5], 4294961152  ;;  %v59_v0 = vld [vmem:[#allocation2 + $0x48] sm:$0xff]  ;;  %v56_v1 = vld [vmem:[#allocation2 + $0x30] sm:$0xff]  ;;  %vm62_vm0 = vcmask 261120   ;;  %vm257_vm1 = vcmask 130048  }
   0xc   :  { %78 = vmatpush.msra.mxu2 %v59_v0  ;;  %v147_v2 = vld [vmem:[#allocation4 + $0x168] sm:$0xff]  ;;  %v53_v3 = vld [vmem:[#allocation2 + $0x18] sm:$0xff]  ;;  %v146_v4 = vld [vmem:[#allocation4 + $0x150] sm:$0xff] }
   0xd   :  { %152 = vmatpush.msra.mxu3 %v147_v2  ;;  %v145_v5 = vld [vmem:[#allocation4 + $0x138] sm:$0xff]  ;;  %v50_v6 = vld [vmem:[#allocation2] sm:$0xff]  ;;  %v60_v9 = vld [vmem:[#allocation2 + $0x50] sm:$0xff] }
   0xe   :  { %79 = vmatpush.msra.mxu2 %v56_v1  ;;  %v366_v7 = vld [vmem:[%s389_s0] sm:$0xff]  ;;  %v143_v10 = vld [vmem:[#allocation4 + $0x108] sm:$0xff]  ;;  %v142_v11 = vld [vmem:[#allocation4 + $0xf0] sm:$0xff] }
   0xf   :  { %153 = vmatpush.msra.mxu3 %v146_v4  ;;  %v144_v8 = vld [vmem:[#allocation4 + $0x120] sm:$0xff]  ;;  %v141_v12 = vld [vmem:[#allocation4 + $0xd8] sm:$0xff]  ;;  %v139_v14 = vld [vmem:[#allocation4 + $0xa8] sm:$0xff] }
  0x10   :  { %80 = vmatpush.msra.mxu2 %v53_v3  ;;  %v140_v13 = vld [vmem:[#allocation4 + $0xc0] sm:$0xff]  ;;  %v138_v15 = vld [vmem:[#allocation4 + $0x90] sm:$0xff]  ;;  %v137_v16 = vld [vmem:[#allocation4 + $0x78] sm:$0xff] }
  0x11   :  { %154 = vmatpush.msra.mxu3 %v145_v5  ;;  %v136_v17 = vld [vmem:[#allocation4 + $0x60] sm:$0xff]  ;;  %v135_v18 = vld [vmem:[#allocation4 + $0x48] sm:$0xff]  ;;  %v134_v19 = vld [vmem:[#allocation4 + $0x30] sm:$0xff] }
  0x12   :  { %81 = vmatpush.msra.mxu2 %v50_v6  ;;  %v57_v20 = vld [vmem:[#allocation2 + $0x38] sm:$0xff]  ;;  %v54_v22 = vld [vmem:[#allocation2 + $0x20] sm:$0xff]  ;;  %v51_v24 = vld [vmem:[#allocation2 + $0x8] sm:$0xff] }
  0x13   :  { %265 = vmatmul.msk.f32.vlgmr.msra.gmra.mxu2 %vm62_vm0, %v366_v7  ;;  %155 = vmatpush.msra.mxu3 %v144_v8  ;;  %v133_v21 = vld [vmem:[#allocation4 + $0x18] sm:$0xff]  ;;  %v132_v23 = vld [vmem:[#allocation4] sm:$0xff]  ;;  %v189_v25 = vld [vmem:[#allocation4 + $0x170] sm:$0xff] }
  0x14   :  { %98 = vmatpush.msrb.mxu2 %v60_v9  ;;  %v188_v26 = vld [vmem:[#allocation4 + $0x158] sm:$0xff]  ;;  %194 = vmatpush.msra.mxu0 %v189_v25  ;;  %v187_v27 = vld [vmem:[#allocation4 + $0x140] sm:$0xff]  ;;  %v186_v29 = vld [vmem:[#allocation4 + $0x128] sm:$0xff] }
  0x15   :  { %156 = vmatpush.msra.mxu3 %v143_v10  ;;  %v61_v28 = vld [vmem:[#allocation2 + $0x58] sm:$0xff]  ;;  %v58_v30 = vld [vmem:[#allocation2 + $0x40] sm:$0xff]  ;;  %v55_v31 = vld [vmem:[#allocation2 + $0x28] sm:$0xff] }
  0x16   :  { %99 = vmatpush.msrb.mxu2 %v57_v20  ;;  %195 = vmatpush.msra.mxu0 %v188_v26  ;;  %v185_v32 = vld [vmem:[#allocation4 + $0x110] sm:$0xff]  ;;  %v184_v33 = vld [vmem:[#allocation4 + $0xf8] sm:$0xff]  ;;  %v183_v34 = vld [vmem:[#allocation4 + $0xe0] sm:$0xff] }
  0x17   :  { %157 = vmatpush.msra.mxu3 %v142_v11  ;;  %v182_v35 = vld [vmem:[#allocation4 + $0xc8] sm:$0xff]  ;;  %v181_v36 = vld [vmem:[#allocation4 + $0xb0] sm:$0xff]  ;;  %v180_v37 = vld [vmem:[#allocation4 + $0x98] sm:$0xff] }
  0x18   :  { %100 = vmatpush.msrb.mxu2 %v54_v22  ;;  %196 = vmatpush.msra.mxu0 %v187_v27  ;;  %v179_v38 = vld [vmem:[#allocation4 + $0x80] sm:$0xff]  ;;  %v178_v39 = vld [vmem:[#allocation4 + $0x68] sm:$0xff]  ;;  %v177_v44 = vld [vmem:[#allocation4 + $0x50] sm:$0xff] }
  0x19   :  { %158 = vmatpush.msra.mxu3 %v141_v12  ;;  %v272_v40 = vld [vmem:[%s392_s3] ss:$0 sm:$0xff]  ;;  %v52_v45 = vld [vmem:[#allocation2 + $0x10] sm:$0xff]  ;;  %v176_v46 = vld [vmem:[#allocation4 + $0x38] sm:$0xff] }
  0x1a   :  { %101 = vmatpush.msrb.mxu2 %v51_v24  ;;  %197 = vmatpush.msra.mxu0 %v186_v29  ;;  %v175_v47 = vld [vmem:[#allocation4 + $0x20] sm:$0xff]  ;;  %v174_v48 = vld [vmem:[#allocation4 + $0x8] sm:$0xff]  ;;  %v231_v49 = vld [vmem:[#allocation4 + $0x178] sm:$0xff] }
  0x1b   :  { %159 = vmatpush.msra.mxu3 %v140_v13  ;;  %266 = vmatmul.msk.f32.vlgmr.msrb.gmra.mxu2 %vm62_vm0, %v366_v7  ;;  %v230_v50 = vld [vmem:[#allocation4 + $0x160] sm:$0xff]  ;;  %v229_v51 = vld [vmem:[#allocation4 + $0x148] sm:$0xff]  ;;  %v228_v52 = vld [vmem:[#allocation4 + $0x130] sm:$0xff] }
  0x1c   :  { %118 = vmatpush.msra.mxu2 %v61_v28  ;;  %198 = vmatpush.msra.mxu0 %v185_v32  ;;  %v227_v53 = vld [vmem:[#allocation4 + $0x118] sm:$0xff]  ;;  %v226_v54 = vld [vmem:[#allocation4 + $0x100] sm:$0xff]  ;;  %v225_v55 = vld [vmem:[#allocation4 + $0xe8] sm:$0xff] }
  0x1d   :  { %160 = vmatpush.msra.mxu3 %v139_v14  ;;  %232 = vmatpush.msra.mxu1 %v231_v49  ;;  %v224_v56 = vld [vmem:[#allocation4 + $0xd0] sm:$0xff]  ;;  %v223_v57 = vld [vmem:[#allocation4 + $0xb8] sm:$0xff]  ;;  %v222_v58 = vld [vmem:[#allocation4 + $0xa0] sm:$0xff] }
  0x1e   :  { %119 = vmatpush.msra.mxu2 %v58_v30  ;;  %199 = vmatpush.msra.mxu0 %v184_v33  ;;  %v221_v59 = vld [vmem:[#allocation4 + $0x88] sm:$0xff]  ;;  %v220_v60 = vld [vmem:[#allocation4 + $0x70] sm:$0xff]  ;;  %v273_v61 = vld [vmem:[%s392_s3 + $0x1] ss:$0 sm:$0xff] }
  0x1f   :  { %161 = vmatpush.msra.mxu3 %v138_v15  ;;  %233 = vmatpush.msra.mxu1 %v230_v50  ;;  %v219_v3 = vld [vmem:[#allocation4 + $0x58] sm:$0xff]  ;;  %v218_v4 = vld [vmem:[#allocation4 + $0x40] sm:$0xff]  ;;  %v217_v5 = vld [vmem:[#allocation4 + $0x28] sm:$0xff] }
  0x20   :  { %120 = vmatpush.msra.mxu2 %v55_v31  ;;  %200 = vmatpush.msra.mxu0 %v183_v34  ;;  %v216_v6 = vld [vmem:[#allocation4 + $0x10] sm:$0xff]  ;;  %v275_v13 = vld [vmem:[%s392_s3 + $0x3] ss:$0 sm:$0xff] }
  0x21   :  { %162 = vmatpush.msra.mxu3 %v137_v16  ;;  %234 = vmatpush.msra.mxu1 %v229_v51 }
  0x22   :  { %201 = vmatpush.msra.mxu0 %v182_v35  ;;  %121 = vmatpush.msra.mxu2 %v52_v45 }
  0x23   :  { %163 = vmatpush.msra.mxu3 %v136_v17  ;;  %267 = vmatmul.msk.f32.vlgmr.msra.gmra.mxu2 %vm62_vm0, %v366_v7  ;;  %v274_v7 = vld [vmem:[%s392_s3 + $0x2] ss:$0 sm:$0xff] }
  0x24   :  { %202 = vmatpush.msra.mxu0 %v181_v36  ;;  %235 = vmatpush.msra.mxu1 %v228_v52 }
  0x25   :  { %164 = vmatpush.msra.mxu3 %v135_v18 }
  0x26   :  { %203 = vmatpush.msra.mxu0 %v180_v37  ;;  %236 = vmatpush.msra.mxu1 %v227_v53 }
  0x27   :  { %165 = vmatpush.msra.mxu3 %v134_v19 }
  0x28   :  { %204 = vmatpush.msra.mxu0 %v179_v38  ;;  %237 = vmatpush.msra.mxu1 %v226_v54 }
  0x29   :  { %166 = vmatpush.msra.mxu3 %v133_v21 }
  0x2a   :  { %205 = vmatpush.msra.mxu0 %v178_v39  ;;  %238 = vmatpush.msra.mxu1 %v225_v55 }
  0x2b   :  { %167 = vmatpush.msra.mxu3 %v132_v23 }
  0x2c   :  { %206 = vmatpush.msra.mxu0 %v177_v44  ;;  %239 = vmatpush.msra.mxu1 %v224_v56 }
  0x2e   :  { %207 = vmatpush.msra.mxu0 %v176_v46  ;;  %240 = vmatpush.msra.mxu1 %v223_v57 }
  0x30   :  { %208 = vmatpush.msra.mxu0 %v175_v47  ;;  %241 = vmatpush.msra.mxu1 %v222_v58 }
  0x32   :  { %209 = vmatpush.msra.mxu0 %v174_v48  ;;  %242 = vmatpush.msra.mxu1 %v221_v59 }
  0x34   :  { %243 = vmatpush.msra.mxu1 %v220_v60 }
  0x36   :  { %244 = vmatpush.msra.mxu1 %v219_v3 }
  0x38   :  { %245 = vmatpush.msra.mxu1 %v218_v4 }
  0x3a   :  { %246 = vmatpush.msra.mxu1 %v217_v5 }
  0x3c   :  { %247 = vmatpush.msra.mxu1 %v216_v6 }
  0x96   :  { %v83_v41 = vpop.f32.mrf.mxu2 }
  0x97   :  { %v130_v42 = vadd.f32 %v272_v40, %v83_v41 }
  0x99   :  { %v131_v43 = vmax.f32 %v130_v42, 0.0 }
  0x9b   :  { %168 = vmatmul.f32.vlgmr.msra.gmra.mxu3 %v131_v43 }
  0x9e   :  { %v103_v63 = vpop.f32.mrf.mxu2 }
  0xa6   :  { %v123_v9 = vpop.f32.mrf.mxu2 }
 0x11e   :  { %v169_v62 = vpop.f32.mrf.mxu3 }
 0x11f   :  { %v170_v0 = vadd.f32 %v273_v61, %v169_v62 }
 0x121   :  { %v172_v1 = vadd.f32 %v170_v0, %v103_v63 }
 0x123   :  { %v173_v2 = vmax.f32 %v172_v1, 0.0 }
 0x125   :  { %210 = vmatmul.f32.vlgmr.msra.gmra.mxu0 %v173_v2 }
 0x1a2   :  { %v211_v8 = vpop.f32.mrf.mxu0 }
 0x1a3   :  { %v212_v10 = vadd.f32 %v274_v7, %v211_v8 }
 0x1a5   :  { %v214_v11 = vadd.f32 %v212_v10, %v123_v9 }
 0x1a7   :  { %v215_v12 = vmax.f32 %v214_v11, 0.0 }
 0x1a9   :  { %248 = vmatmul.f32.vlgmr.msra.gmra.mxu1 %v215_v12 }
 0x226   :  { %v249_v14 = vpop.f32.mrf.mxu1 }
 0x227   :  { %v256_v15 = vadd.f32 %v275_v13, %v249_v14 }
 0x229   :  { %258 = vst.msk [vmem:[%s393_s4] sm:$0xff] %vm257_vm1, %v256_v15 }
 0x22a   :  { %263 = vsyncpa [#allocation3], 1 }
 0x22b   :  { %264 = vsyncpa [#allocation5], 1 }

</bundles_post_ra>
